<compile_context>
chip_gen: v7x
topology: tpu7x:2x2x1
jax: 0.10.0
libtpu: 0.0.40
codegen_flags: <defaults>
</compile_context>

<pallas_src>
import jax
import jax.numpy as jnp
from jax.experimental import pallas as pl
from jax.experimental.pallas import tpu as pltpu


def _critic_kernel(x_ref,
                   w1_ref, b1_ref,
                   w2_ref, b2_ref,
                   w3_ref, b3_ref,
                   w4_ref, b4_ref,
                   w5_ref, b5_ref,
                   out_ref):
    """(Linear -> ReLU) x 4 -> Linear(., 1) for one batch tile."""
    h = x_ref[...]                                             # (TB, S) f32

    # Hidden layers: bf16 MXU matmul, f32 accumulation, f32 bias + ReLU.
    for w_ref, b_ref in ((w1_ref, b1_ref), (w2_ref, b2_ref),
                         (w3_ref, b3_ref), (w4_ref, b4_ref)):
        h = jnp.dot(h.astype(jnp.bfloat16), w_ref[...],
                    preferred_element_type=jnp.float32) + b_ref[...]
        h = jnp.maximum(h, 0.0)                                # (TB, H) f32

    # Final H -> 1 projection: VPU multiply + lane reduction (keep f32).
    v = jnp.sum(h * w5_ref[...], axis=-1, keepdims=True) + b5_ref[...]
    out_ref[...] = v.astype(out_ref.dtype)                     # (TB, 1)


def critic_forward(state, params, *, batch_tile=128,
                   vmem_limit_bytes=32 * 1024 * 1024):
    """state: (B, state_dim) f32 -> value: (B, 1) f32."""
    (w1, b1), (w2, b2), (w3, b3), (w4, b4), (w5, b5) = params
    B, state_dim = state.shape
    H = w1.shape[1]

    state = state.astype(jnp.float32)

    # Pick a batch tile and pad B so every tile is full (tail handled by slicing).
    if B <= batch_tile:
        B_pad = max(8, ((B + 7) // 8) * 8)          # one full-array tile
        TB = B_pad
    else:
        TB = batch_tile                              # multiple of 8
        B_pad = pl.cdiv(B, TB) * TB
    if B_pad != B:
        state = jnp.pad(state, ((0, B_pad - B), (0, 0)))

    # Hidden weights in bf16; biases as (1, H) rows; final layer in f32.
    w1b, w2b, w3b, w4b = (w.astype(jnp.bfloat16) for w in (w1, w2, w3, w4))
    b1r, b2r, b3r, b4r = (b.reshape(1, -1).astype(jnp.float32)
                          for b in (b1, b2, b3, b4))
    w5r = w5.reshape(1, H).astype(jnp.float32)       # (1, H) weight row
    b5r = b5.reshape(1, 1).astype(jnp.float32)       # (1, 1) scalar tile

    def resident(arr):
        # Full-array block, constant block index -> stays in VMEM across tiles.
        return pl.BlockSpec(arr.shape, lambda i: tuple(0 for _ in arr.shape))

    in_specs = [
        pl.BlockSpec((TB, state_dim), lambda i: (i, 0)),       # batch-tiled input
        resident(w1b), resident(b1r),
        resident(w2b), resident(b2r),
        resident(w3b), resident(b3r),
        resident(w4b), resident(b4r),
        resident(w5r), resident(b5r),
    ]
    out_spec = pl.BlockSpec((TB, 1), lambda i: (i, 0))
    out_shape = jax.ShapeDtypeStruct((B_pad, 1), jnp.float32)

    out = pl.pallas_call(
        _critic_kernel,
        out_shape=out_shape,
        grid_spec=pltpu.PrefetchScalarGridSpec(
            num_scalar_prefetch=0,
            grid=(B_pad // TB,),
            in_specs=in_specs,
            out_specs=out_spec,
        ),
        compiler_params=pltpu.CompilerParams(
            dimension_semantics=("parallel",),      # shards batch tiles on v7x's 2 TCs
            vmem_limit_bytes=vmem_limit_bytes,
        ),
    )(state, w1b, b1r, w2b, b2r, w3b, b3r, w4b, b4r, w5r, b5r)

    return out[:B] if B_pad != B else out


# ----------------------------------------------------------------------------
# Parameter init (mirrors PyTorch orthogonal_init: orthogonal W, zero bias).
# ----------------------------------------------------------------------------
def orthogonal_linear_params(key, in_dim, out_dim, gain=1.0):
    w_pt = jax.nn.initializers.orthogonal(scale=gain)(
        key, (out_dim, in_dim), jnp.float32)        # PyTorch layout (out, in)
    w = jnp.transpose(w_pt)                          # stored as (in, out)
    b = jnp.zeros((out_dim,), jnp.float32)
    return w, b


def init_critic_params(key, state_dim, hidden_size):
    keys = jax.random.split(key, 5)
    dims = [(state_dim, hidden_size),
            (hidden_size, hidden_size),
            (hidden_size, hidden_size),
            (hidden_size, hidden_size),
            (hidden_size, 1)]
    return tuple(orthogonal_linear_params(k, i, o) for k, (i, o) in zip(keys, dims))


# ----------------------------------------------------------------------------
# References for checking.
# ----------------------------------------------------------------------------
def critic_ref_f32(state, params):
    """Pure f32 reference (matches the PyTorch module numerics)."""
    h = state.astype(jnp.float32)
    for i, (w, b) in enumerate(params):
        h = h @ w + b
        if i < len(params) - 1:
            h = jnp.maximum(h, 0.0)
    return h


def critic_ref_matched(state, params):
    """Reference that mimics the kernel's bf16-operand / f32-accum numerics."""
    (w1, b1), (w2, b2), (w3, b3), (w4, b4), (w5, b5) = params
    h = state.astype(jnp.float32)
    for w, b in ((w1, b1), (w2, b2), (w3, b3), (w4, b4)):
        h = jnp.dot(h.astype(jnp.bfloat16), w.astype(jnp.bfloat16),
                    preferred_element_type=jnp.float32) + b.reshape(1, -1)
        h = jnp.maximum(h, 0.0)
    return jnp.sum(h * w5.reshape(1, -1), axis=-1, keepdims=True) + b5.reshape(1, 1)


if __name__ == "__main__":
    key = jax.random.PRNGKey(0)
    k_params, k_state = jax.random.split(key)

    batch = 8
    state_dim = 16
    hidden_size = 32     # small stand-in for the module's default 512

    params = init_critic_params(k_params, state_dim, hidden_size)
    state = jax.random.normal(k_state, (batch, state_dim), dtype=jnp.float32)

    out = critic_forward(state, params)
    out = jax.block_until_ready(out)
    assert out.shape == (batch, 1), out.shape

    # Tight check vs. a reference with the same bf16/f32 mixed precision.
    ref_m = critic_ref_matched(state, params)
    assert jnp.allclose(out, ref_m, atol=1e-3, rtol=1e-3), (out, ref_m)

    # Loose check vs. the pure-f32 (PyTorch-equivalent) reference.
    ref_f = critic_ref_f32(state, params)
    assert jnp.allclose(out, ref_f, atol=5e-2, rtol=5e-2), (out, ref_f)

    print("KERNEL_OK")
</pallas_src>

<mosaic_0001>
module attributes {stable_mosaic.version = 11 : i64} {
  func.func @_critic_kernel(%arg0: i32, %arg1: memref<8x16xf32, #tpu.memory_space<vmem>>, %arg2: memref<16x32xbf16, #tpu.memory_space<vmem>>, %arg3: memref<1x32xf32, #tpu.memory_space<vmem>>, %arg4: memref<32x32xbf16, #tpu.memory_space<vmem>>, %arg5: memref<1x32xf32, #tpu.memory_space<vmem>>, %arg6: memref<32x32xbf16, #tpu.memory_space<vmem>>, %arg7: memref<1x32xf32, #tpu.memory_space<vmem>>, %arg8: memref<32x32xbf16, #tpu.memory_space<vmem>>, %arg9: memref<1x32xf32, #tpu.memory_space<vmem>>, %arg10: memref<1x32xf32, #tpu.memory_space<vmem>>, %arg11: memref<1x1xf32, #tpu.memory_space<vmem>>, %arg12: memref<8x1xf32, #tpu.memory_space<vmem>>) attributes {dimension_semantics = [#tpu.dimension_semantics<parallel>], iteration_bounds = array<i64: 1>, scalar_prefetch = 0 : i64, scratch_operands = 0 : i64, tpu.core_type = #tpu.core_type<tc>, window_params = [{transform_indices = @transform_0, window_bounds = array<i64: 8, 16>}, {pipeline_mode = #tpu.pipeline_mode<synchronous>, transform_indices = @transform_1, window_bounds = array<i64: 16, 32>}, {pipeline_mode = #tpu.pipeline_mode<synchronous>, transform_indices = @transform_2, window_bounds = array<i64: 1, 32>}, {pipeline_mode = #tpu.pipeline_mode<synchronous>, transform_indices = @transform_3, window_bounds = array<i64: 32, 32>}, {pipeline_mode = #tpu.pipeline_mode<synchronous>, transform_indices = @transform_4, window_bounds = array<i64: 1, 32>}, {pipeline_mode = #tpu.pipeline_mode<synchronous>, transform_indices = @transform_5, window_bounds = array<i64: 32, 32>}, {pipeline_mode = #tpu.pipeline_mode<synchronous>, transform_indices = @transform_6, window_bounds = array<i64: 1, 32>}, {pipeline_mode = #tpu.pipeline_mode<synchronous>, transform_indices = @transform_7, window_bounds = array<i64: 32, 32>}, {pipeline_mode = #tpu.pipeline_mode<synchronous>, transform_indices = @transform_8, window_bounds = array<i64: 1, 32>}, {pipeline_mode = #tpu.pipeline_mode<synchronous>, transform_indices = @transform_9, window_bounds = array<i64: 1, 32>}, {pipeline_mode = #tpu.pipeline_mode<synchronous>, transform_indices = @transform_10, window_bounds = array<i64: 1, 1>}, {transform_indices = @transform_11, window_bounds = array<i64: 8, 1>}]} {
    %c0 = arith.constant 0 : index
    %c0_0 = arith.constant 0 : index
    %0 = vector.load %arg1[%c0, %c0_0] : memref<8x16xf32, #tpu.memory_space<vmem>>, vector<8x16xf32>
    %1 = arith.truncf %0 : vector<8x16xf32> to vector<8x16xbf16>
    %c0_1 = arith.constant 0 : index
    %c0_2 = arith.constant 0 : index
    %2 = vector.load %arg2[%c0_1, %c0_2] : memref<16x32xbf16, #tpu.memory_space<vmem>>, vector<16x32xbf16>
    %cst = arith.constant dense<0.000000e+00> : vector<8x32xf32>
    %3 = tpu.matmul %1, %2, %cst {dimension_numbers = #tpu.dot_dimension_numbers<[1], [0], [0], [1], [0, 0, 1, 1], [], []>} : vector<8x16xbf16>, vector<16x32xbf16>, vector<8x32xf32> -> vector<8x32xf32>
    %c0_3 = arith.constant 0 : index
    %c0_4 = arith.constant 0 : index
    %4 = vector.load %arg3[%c0_3, %c0_4] : memref<1x32xf32, #tpu.memory_space<vmem>>, vector<1x32xf32>
    %5 = vector.broadcast %4 : vector<1x32xf32> to vector<8x32xf32>
    %6 = arith.addf %3, %5 : vector<8x32xf32>
    %cst_5 = arith.constant 0.000000e+00 : f32
    %7 = vector.broadcast %cst_5 : f32 to vector<8x32xf32>
    %8 = arith.maximumf %6, %7 : vector<8x32xf32>
    %9 = arith.truncf %8 : vector<8x32xf32> to vector<8x32xbf16>
    %c0_6 = arith.constant 0 : index
    %c0_7 = arith.constant 0 : index
    %10 = vector.load %arg4[%c0_6, %c0_7] : memref<32x32xbf16, #tpu.memory_space<vmem>>, vector<32x32xbf16>
    %cst_8 = arith.constant dense<0.000000e+00> : vector<8x32xf32>
    %11 = tpu.matmul %9, %10, %cst_8 {dimension_numbers = #tpu.dot_dimension_numbers<[1], [0], [0], [1], [0, 0, 1, 1], [], []>} : vector<8x32xbf16>, vector<32x32xbf16>, vector<8x32xf32> -> vector<8x32xf32>
    %c0_9 = arith.constant 0 : index
    %c0_10 = arith.constant 0 : index
    %12 = vector.load %arg5[%c0_9, %c0_10] : memref<1x32xf32, #tpu.memory_space<vmem>>, vector<1x32xf32>
    %13 = vector.broadcast %12 : vector<1x32xf32> to vector<8x32xf32>
    %14 = arith.addf %11, %13 : vector<8x32xf32>
    %cst_11 = arith.constant 0.000000e+00 : f32
    %15 = vector.broadcast %cst_11 : f32 to vector<8x32xf32>
    %16 = arith.maximumf %14, %15 : vector<8x32xf32>
    %17 = arith.truncf %16 : vector<8x32xf32> to vector<8x32xbf16>
    %c0_12 = arith.constant 0 : index
    %c0_13 = arith.constant 0 : index
    %18 = vector.load %arg6[%c0_12, %c0_13] : memref<32x32xbf16, #tpu.memory_space<vmem>>, vector<32x32xbf16>
    %cst_14 = arith.constant dense<0.000000e+00> : vector<8x32xf32>
    %19 = tpu.matmul %17, %18, %cst_14 {dimension_numbers = #tpu.dot_dimension_numbers<[1], [0], [0], [1], [0, 0, 1, 1], [], []>} : vector<8x32xbf16>, vector<32x32xbf16>, vector<8x32xf32> -> vector<8x32xf32>
    %c0_15 = arith.constant 0 : index
    %c0_16 = arith.constant 0 : index
    %20 = vector.load %arg7[%c0_15, %c0_16] : memref<1x32xf32, #tpu.memory_space<vmem>>, vector<1x32xf32>
    %21 = vector.broadcast %20 : vector<1x32xf32> to vector<8x32xf32>
    %22 = arith.addf %19, %21 : vector<8x32xf32>
    %cst_17 = arith.constant 0.000000e+00 : f32
    %23 = vector.broadcast %cst_17 : f32 to vector<8x32xf32>
    %24 = arith.maximumf %22, %23 : vector<8x32xf32>
    %25 = arith.truncf %24 : vector<8x32xf32> to vector<8x32xbf16>
    %c0_18 = arith.constant 0 : index
    %c0_19 = arith.constant 0 : index
    %26 = vector.load %arg8[%c0_18, %c0_19] : memref<32x32xbf16, #tpu.memory_space<vmem>>, vector<32x32xbf16>
    %cst_20 = arith.constant dense<0.000000e+00> : vector<8x32xf32>
    %27 = tpu.matmul %25, %26, %cst_20 {dimension_numbers = #tpu.dot_dimension_numbers<[1], [0], [0], [1], [0, 0, 1, 1], [], []>} : vector<8x32xbf16>, vector<32x32xbf16>, vector<8x32xf32> -> vector<8x32xf32>
    %c0_21 = arith.constant 0 : index
    %c0_22 = arith.constant 0 : index
    %28 = vector.load %arg9[%c0_21, %c0_22] : memref<1x32xf32, #tpu.memory_space<vmem>>, vector<1x32xf32>
    %29 = vector.broadcast %28 : vector<1x32xf32> to vector<8x32xf32>
    %30 = arith.addf %27, %29 : vector<8x32xf32>
    %cst_23 = arith.constant 0.000000e+00 : f32
    %31 = vector.broadcast %cst_23 : f32 to vector<8x32xf32>
    %32 = arith.maximumf %30, %31 : vector<8x32xf32>
    %c0_24 = arith.constant 0 : index
    %c0_25 = arith.constant 0 : index
    %33 = vector.load %arg10[%c0_24, %c0_25] : memref<1x32xf32, #tpu.memory_space<vmem>>, vector<1x32xf32>
    %34 = vector.broadcast %33 : vector<1x32xf32> to vector<8x32xf32>
    %35 = arith.mulf %32, %34 : vector<8x32xf32>
    %cst_26 = arith.constant dense<0.000000e+00> : vector<8xf32>
    %36 = vector.multi_reduction <add>, %35, %cst_26 [1] : vector<8x32xf32> to vector<8xf32>
    %37 = vector.shape_cast %36 : vector<8xf32> to vector<8x1xf32>
    %c0_27 = arith.constant 0 : index
    %c0_28 = arith.constant 0 : index
    %38 = vector.load %arg11[%c0_27, %c0_28] : memref<1x1xf32, #tpu.memory_space<vmem>>, vector<1x1xf32>
    %39 = vector.broadcast %38 : vector<1x1xf32> to vector<8x1xf32>
    %40 = arith.addf %37, %39 : vector<8x1xf32>
    %c0_29 = arith.constant 0 : index
    %c0_30 = arith.constant 0 : index
    %41 = vector.load %arg12[%c0_29, %c0_30] : memref<8x1xf32, #tpu.memory_space<vmem>>, vector<8x1xf32>
    tpu.vector_store %arg12[%c0_29, %c0_30], %40 {strides = array<i32>} : memref<8x1xf32, #tpu.memory_space<vmem>>, vector<8x1xf32>,
    return
  }
  func.func @transform_0(%arg0: i32) -> (i32, i32) {
    %c0_i32 = arith.constant 0 : i32
    %c0_i32_0 = arith.constant 0 : i32
    return %arg0, %c0_i32 : i32, i32
  }
  func.func @transform_1(%arg0: i32) -> (i32, i32) {
    %c0_i32 = arith.constant 0 : i32
    %c0_i32_0 = arith.constant 0 : i32
    %c0_i32_1 = arith.constant 0 : i32
    return %c0_i32, %c0_i32_0 : i32, i32
  }
  func.func @transform_2(%arg0: i32) -> (i32, i32) {
    %c0_i32 = arith.constant 0 : i32
    %c0_i32_0 = arith.constant 0 : i32
    %c0_i32_1 = arith.constant 0 : i32
    return %c0_i32, %c0_i32_0 : i32, i32
  }
  func.func @transform_3(%arg0: i32) -> (i32, i32) {
    %c0_i32 = arith.constant 0 : i32
    %c0_i32_0 = arith.constant 0 : i32
    %c0_i32_1 = arith.constant 0 : i32
    return %c0_i32, %c0_i32_0 : i32, i32
  }
  func.func @transform_4(%arg0: i32) -> (i32, i32) {
    %c0_i32 = arith.constant 0 : i32
    %c0_i32_0 = arith.constant 0 : i32
    %c0_i32_1 = arith.constant 0 : i32
    return %c0_i32, %c0_i32_0 : i32, i32
  }
  func.func @transform_5(%arg0: i32) -> (i32, i32) {
    %c0_i32 = arith.constant 0 : i32
    %c0_i32_0 = arith.constant 0 : i32
    %c0_i32_1 = arith.constant 0 : i32
    return %c0_i32, %c0_i32_0 : i32, i32
  }
  func.func @transform_6(%arg0: i32) -> (i32, i32) {
    %c0_i32 = arith.constant 0 : i32
    %c0_i32_0 = arith.constant 0 : i32
    %c0_i32_1 = arith.constant 0 : i32
    return %c0_i32, %c0_i32_0 : i32, i32
  }
  func.func @transform_7(%arg0: i32) -> (i32, i32) {
    %c0_i32 = arith.constant 0 : i32
    %c0_i32_0 = arith.constant 0 : i32
    %c0_i32_1 = arith.constant 0 : i32
    return %c0_i32, %c0_i32_0 : i32, i32
  }
  func.func @transform_8(%arg0: i32) -> (i32, i32) {
    %c0_i32 = arith.constant 0 : i32
    %c0_i32_0 = arith.constant 0 : i32
    %c0_i32_1 = arith.constant 0 : i32
    return %c0_i32, %c0_i32_0 : i32, i32
  }
  func.func @transform_9(%arg0: i32) -> (i32, i32) {
    %c0_i32 = arith.constant 0 : i32
    %c0_i32_0 = arith.constant 0 : i32
    %c0_i32_1 = arith.constant 0 : i32
    return %c0_i32, %c0_i32_0 : i32, i32
  }
  func.func @transform_10(%arg0: i32) -> (i32, i32) {
    %c0_i32 = arith.constant 0 : i32
    %c0_i32_0 = arith.constant 0 : i32
    %c0_i32_1 = arith.constant 0 : i32
    return %c0_i32, %c0_i32_0 : i32, i32
  }
  func.func @transform_11(%arg0: i32) -> (i32, i32) {
    %c0_i32 = arith.constant 0 : i32
    %c0_i32_0 = arith.constant 0 : i32
    return %arg0, %c0_i32 : i32, i32
  }
}

</mosaic_0001>

<bundles_post_ra>
// kernel: tpu_custom_call.1
= control target key start
LH: loop header
LB: loop body
LE: loop exit
PB: predicated region body
PF: predicated region fallthrough
CT: control target
= control target key end

     0   :  { %s716_s0 = inlined_call_operand.hbm [shape: f32[8,16], index: 0, kind: input, shape index: {}]   ;;  %s717_s1 = inlined_call_operand.hbm [shape: bf16[16,32], index: 1, kind: input, shape index: {}]   ;;  %s718_s2 = inlined_call_operand.vmem [shape: f32[1,32], index: 2, kind: input, shape index: {}]   ;;  %s719_s3 = inlined_call_operand.hbm [shape: bf16[32,32], index: 3, kind: input, shape index: {}]   ;;  %s720_s4 = inlined_call_operand.vmem [shape: f32[1,32], index: 4, kind: input, shape index: {}]   ;;  %s721_s5 = inlined_call_operand.vmem [shape: bf16[32,32], index: 5, kind: input, shape index: {}]   ;;  %s722_s6 = inlined_call_operand.vmem [shape: f32[1,32], index: 6, kind: input, shape index: {}]   ;;  %s723_s7 = inlined_call_operand.hbm [shape: bf16[32,32], index: 7, kind: input, shape index: {}]   ;;  %s724_s8 = inlined_call_operand.vmem [shape: f32[1,32], index: 8, kind: input, shape index: {}]   ;;  %s725_s9 = inlined_call_operand.vmem [shape: f32[1,32], index: 9, kind: input, shape index: {}]   ;;  %s726_s10 = inlined_call_operand.<no memory space> [shape: f32[1,1], index: 10, kind: input, shape index: {}]   ;;  %s727_s11 = inlined_call_operand.vmem [shape: f32[8,1], index: 11, kind: output, shape index: {}]  }
   0x1   :  { %v16_v0 = vstv %s726_s10 }
   0x2   :  { %17 = vst [vmem:[#allocation2] sm:$0x1] %v16_v0 }
   0x3   :  { %18 = vsyncpa [#allocation4], 0 }
   0x4   :  { %19 = vsyncpa [#allocation6], 0 }
   0x5   :  { %20 = vsyncpa [#allocation9], 0  ;;  %s556_s19 = smov [#allocation5]   ;;  %s462_s23 = scalar_lea.hbm %s717_s1, 128 }
   0x6   :  { %s36_s20 = sshll.u32 %s556_s19, 4  ;;  %p463_p0 = scmp.ne.s32.totalorder %s717_s1, %s462_s23  ;;  %s37_s20 = int_to_ptr.vmem [resolvable:$true] %s36_s20 }
   0x7   :  { %p466_p1 = scmp.lt.u32.totalorder %s462_s23, %s717_s1 }
   0x9   :  { %p468_p2 = pnand %p466_p1, %p463_p0 }
   0xb   :  { %471 = shalt.err (!%p468_p2)
}
   0xc   :  { %s472_s10 = scalar_lea.vmem %s37_s20, 128  ;;  %p477_p4 = scmp.lt.s32.totalorder %s37_s20, %s37_s20 }
   0xd   :  { %p473_p3 = scmp.ne.s32.totalorder %s37_s20, %s472_s10  ;;  %p478_p5 = scmp.lt.s32.totalorder %s472_s10, %s472_s10 }
   0xf   :  { %p479_p6 = por %p478_p5, %p477_p4 }
  0x11   :  { %p480_p7 = pnand %p479_p6, %p473_p3 }
  0x13   :  { %483 = shalt.err (!%p480_p7)
}
  0x14   :  { %s557_s28 = smov 64   ;;  %s558_s29 = smov 4  }
  0x15   :  { %42 = dma.hbm_to_vmem [thread:$0]  %s717_s1, 128, %s37_s20, [#allocation6], %s557_s28, %s557_s28, %s558_s29  }
  0x16   :  { %s559_s13 = smov [#allocation3]   ;;  %s560_s15 = smov [#allocation7]  }
  0x17   :  { %s27_s14 = sshll.u32 %s559_s13, 4  ;;  %s50_s16 = sshll.u32 %s560_s15, 4  ;;  %s28_s14 = int_to_ptr.vmem [resolvable:$true] %s27_s14  ;;  %s51_s16 = int_to_ptr.vmem [resolvable:$true] %s50_s16 }
  0x18   :  { %s484_s19 = scalar_lea.hbm %s716_s0, 128 }
  0x19   :  { %p485_p8 = scmp.ne.s32.totalorder %s716_s0, %s484_s19  ;;  %p488_p9 = scmp.lt.u32.totalorder %s484_s19, %s716_s0 }
  0x1b   :  { %p490_p10 = pnand %p488_p9, %p485_p8 }
  0x1d   :  { %493 = shalt.err (!%p490_p10)
}
  0x1e   :  { %s494_s1 = scalar_lea.vmem %s28_s14, 128  ;;  %p499_p12 = scmp.lt.s32.totalorder %s28_s14, %s28_s14 }
  0x1f   :  { %p495_p11 = scmp.ne.s32.totalorder %s28_s14, %s494_s1  ;;  %p500_p13 = scmp.lt.s32.totalorder %s494_s1, %s494_s1 }
  0x21   :  { %p501_p0 = por %p500_p13, %p499_p12 }
  0x23   :  { %p502_p1 = pnand %p501_p0, %p495_p11 }
  0x25   :  { %505 = shalt.err (!%p502_p1)
}
  0x26   :  { %30 = dma.hbm_to_vmem [thread:$0]  %s716_s0, 128, %s28_s14, [#allocation4]  }
  0x27   :  { %s506_s10 = scalar_lea.hbm %s719_s3, 256 }
  0x28   :  { %p507_p2 = scmp.ne.s32.totalorder %s719_s3, %s506_s10  ;;  %p510_p3 = scmp.lt.u32.totalorder %s506_s10, %s719_s3 }
  0x2a   :  { %p512_p4 = pnand %p510_p3, %p507_p2 }
  0x2c   :  { %515 = shalt.err (!%p512_p4)
}
  0x2d   :  { %s516_s17 = scalar_lea.vmem %s51_s16, 256  ;;  %p521_p6 = scmp.lt.s32.totalorder %s51_s16, %s51_s16 }
  0x2e   :  { %p517_p5 = scmp.ne.s32.totalorder %s51_s16, %s516_s17  ;;  %p522_p7 = scmp.lt.s32.totalorder %s516_s17, %s516_s17 }
  0x30   :  { %p523_p8 = por %p522_p7, %p521_p6 }
  0x32   :  { %p524_p9 = pnand %p523_p8, %p517_p5 }
  0x34   :  { %527 = shalt.err (!%p524_p9)
}
  0x35   :  { %56 = dma.hbm_to_vmem [thread:$0]  %s719_s3, 256, %s51_s16, [#allocation6], %s557_s28, %s557_s28, %s558_s29  }
  0x36   :  { %s561_s18 = smov [#allocation8]   ;;  %s528_s23 = scalar_lea.hbm %s723_s7, 256 }
  0x37   :  { %s68_s19 = sshll.u32 %s561_s18, 4  ;;  %p529_p10 = scmp.ne.s32.totalorder %s723_s7, %s528_s23  ;;  %s69_s19 = int_to_ptr.vmem [resolvable:$true] %s68_s19 }
  0x38   :  { %p532_p11 = scmp.lt.u32.totalorder %s528_s23, %s723_s7 }
  0x3a   :  { %p534_p12 = pnand %p532_p11, %p529_p10 }
  0x3c   :  { %537 = shalt.err (!%p534_p12)
}
  0x3d   :  { %s538_s26 = scalar_lea.vmem %s69_s19, 256  ;;  %p543_p0 = scmp.lt.s32.totalorder %s69_s19, %s69_s19 }
  0x3e   :  { %p539_p13 = scmp.ne.s32.totalorder %s69_s19, %s538_s26  ;;  %p544_p1 = scmp.lt.s32.totalorder %s538_s26, %s538_s26 }
  0x40   :  { %p545_p2 = por %p544_p1, %p543_p0 }
  0x42   :  { %p546_p3 = pnand %p545_p2, %p539_p13 }
  0x44   :  { %549 = shalt.err (!%p546_p3)
}
  0x45   :  { %74 = dma.hbm_to_vmem [thread:$0]  %s723_s7, 256, %s69_s19, [#allocation9], %s557_s28, %s557_s28, %s558_s29  }
  0x46   :  { %550 = dma.done.wait [#allocation4], 128  }
  0x47   :  { %551 = vsyncadd [#allocation4], 4294967168 }
  0x48   :  { %552 = dma.done.wait [#allocation6], 384  }
  0x49   :  { %553 = vsyncadd [#allocation6], 4294966912 }
  0x4a   :  { %554 = dma.done.wait [#allocation9], 256  }
  0x4b   :  { %555 = vsyncadd [#allocation9], 4294967040  ;;  %v562_v1 = vmov 0.0   ;;  %vm563_vm0 = vmmov 0   ;;  %v455_v2 = vld [vmem:[#allocation5] sm:$0xff]   ;;  %v94_v3 = vld [vmem:[#allocation3] sm:$0xff] }
  0x4c   :  { %417 = vmatprep.subr.bf16.mxu0 %v562_v1  ;;  %419 = vmatprep.mubr.msk.bf16.mxu0 %vm563_vm0, %v562_v1  ;;  %vm111_vm1 = vcmask 130048   ;;  %v95_v4 = vpack.c.bf16 %v94_v3, %v94_v3  ;;  %v456_v5 = vld [vmem:[#allocation7] sm:$0xff]   ;;  %v457_v6 = vld [vmem:[#allocation7 + $0x8] sm:$0xff]   ;;  %vm180_vm2 = vcmask 261120   ;;  %v459_v16 = vld [vmem:[%s721_s5 + $0x8] sm:$0xff]   ;;  %vm380_vm3 = vcmask 7168  }
  0x4d   :  { %423 = vmatprep.subr.bf16.mxu1 %v562_v1  ;;  %427 = vmatprep.mubr.msk.bf16.mxu1 %vm563_vm0, %v562_v1  ;;  %v458_v7 = vld [vmem:[%s721_s5] sm:$0xff]   ;;  %v461_v26 = vld [vmem:[#allocation8 + $0x8] sm:$0xff]  }
  0x4e   :  { %418 = vmatpush3.bf16.msra.mxu0 %v455_v2  ;;  %424 = vmatpush3.bf16.msra.mxu1 %v456_v5  ;;  %v389_v8 = vld [vmem:[%s718_s2] ss:$0 sm:$0xff]  ;;  %v460_v17 = vld [vmem:[#allocation8] sm:$0xff]  }
  0x4f   :  { %431 = vmatprep.subr.bf16.mxu0 %v562_v1  ;;  %425 = vmatprep.subr.bf16.mxu1 %v562_v1  ;;  %v392_v18 = vld [vmem:[%s720_s4] ss:$0 sm:$0xff] }
  0x50   :  { %v396_v27 = vld [vmem:[%s722_s6] ss:$0 sm:$0xff] }
  0x51   :  { %420 = vmatmul.mubr.msk.bf16.vlgmr.msra.gmra.mrb[0].mxu0 %vm111_vm1, %v95_v4  ;;  %v400_v35 = vld [vmem:[%s724_s8] ss:$0 sm:$0xff] }
  0x52   :  { %435 = vmatprep.mubr.msk.bf16.mxu0 %vm563_vm0, %v562_v1  ;;  %426 = vmatpush3.bf16.msra.mxu1 %v457_v6  ;;  %v404_v40 = vld [vmem:[%s725_s9] ss:$0 sm:$0xff] }
  0x53   :  { %439 = vmatprep.subr.bf16.mxu1 %v562_v1  ;;  %432 = vmatpush3.bf16.msra.mxu0 %v458_v7  ;;  %v405_v45 = vld [vmem:[#allocation2] ss:$0 sm:$0xff] }
  0x54   :  { %433 = vmatprep.subr.bf16.mxu0 %v562_v1 }
  0x57   :  { %434 = vmatpush3.bf16.msra.mxu0 %v459_v16 }
 0x124   :  { %v149_v9 = vpop.f32.mrb[0].mxu0 }
 0x125   :  { %v150_v10 = vadd.f32 %v389_v8, %v149_v9  ;;  %v421_v11 = vpop.f32.mrb[1].mxu0 }
 0x126   :  { %v152_v12 = vpop.f32.mrb[2].mxu0 }
 0x127   :  { %v155_v13 = vmax.f32 %v150_v10, 0.0  ;;  %v422_v14 = vpop.f32.mrb[3].mxu0 }
 0x129   :  { %v156_v15 = vpack.c.bf16 %v155_v13, %v155_v13 }
 0x12b   :  { %428 = vmatmul.mubr.msk.bf16.vlgmr.msra.gmra.mrb[0].mxu1 %vm180_vm2, %v156_v15 }
 0x12c   :  { %443 = vmatprep.mubr.msk.bf16.mxu1 %vm563_vm0, %v562_v1  ;;  %440 = vmatpush3.bf16.msra.mxu1 %v460_v17 }
 0x12d   :  { %441 = vmatprep.subr.bf16.mxu1 %v562_v1 }
 0x130   :  { %442 = vmatpush3.bf16.msra.mxu1 %v461_v26 }
 0x1fe   :  { %v218_v19 = vpop.f32.mrb[0].mxu1 }
 0x1ff   :  { %v219_v20 = vadd.f32 %v392_v18, %v218_v19  ;;  %v429_v21 = vpop.f32.mrb[1].mxu1 }
 0x200   :  { %v221_v22 = vpop.f32.mrb[2].mxu1 }
 0x201   :  { %v224_v23 = vmax.f32 %v219_v20, 0.0  ;;  %v430_v24 = vpop.f32.mrb[3].mxu1 }
 0x203   :  { %v225_v25 = vpack.c.bf16 %v224_v23, %v224_v23 }
 0x205   :  { %436 = vmatmul.mubr.msk.bf16.vlgmr.msra.gmra.mrb[4].mxu0 %vm180_vm2, %v225_v25 }
 0x2d8   :  { %v286_v28 = vpop.f32.mrb[4].mxu0 }
 0x2d9   :  { %v287_v29 = vadd.f32 %v396_v27, %v286_v28  ;;  %v437_v30 = vpop.f32.mrb[5].mxu0 }
 0x2da   :  { %v289_v31 = vpop.f32.mrb[6].mxu0 }
 0x2db   :  { %v292_v32 = vmax.f32 %v287_v29, 0.0  ;;  %v438_v33 = vpop.f32.mrb[7].mxu0 }
 0x2dd   :  { %v293_v34 = vpack.c.bf16 %v292_v32, %v292_v32 }
 0x2df   :  { %444 = vmatmul.mubr.msk.bf16.vlgmr.msra.gmra.mrb[4].mxu1 %vm180_vm2, %v293_v34 }
 0x3b2   :  { %v354_v36 = vpop.f32.mrb[4].mxu1 }
 0x3b3   :  { %v355_v37 = vadd.f32 %v400_v35, %v354_v36  ;;  %v445_v38 = vpop.f32.mrb[5].mxu1 }
 0x3b4   :  { %v357_v39 = vpop.f32.mrb[6].mxu1 }
 0x3b5   :  { %v360_v41 = vmax.f32 %v355_v37, 0.0  ;;  %v446_v42 = vpop.f32.mrb[7].mxu1 }
 0x3b7   :  { %v368_v43 = vmul.f32 %v404_v40, %v360_v41 }
 0x3b9   :  { %v369_v44 = vsel %vm180_vm2, %v368_v43, 0.0 }
 0x3ba   :  { %370 = vadd.xlane.f32.xlu0 %v369_v44 }
 0x447   :  { %v371_v46 = vpop.xlane.xlu0 %370 }
 0x448   :  { %v379_v47 = vadd.f32 %v405_v45, %v371_v46 }
 0x44a   :  { %381 = vst.msk [vmem:[%s727_s11] sm:$0xff] %vm380_vm3, %v379_v47 }
 0x44b   :  { %386 = vsyncpa [#allocation4], 1 }
 0x44c   :  { %387 = vsyncpa [#allocation6], 1 }
 0x44d   :  { %388 = vsyncpa [#allocation9], 1 }

</bundles_post_ra>
